<compile_context>
chip_gen: v5e
topology: v5e:2x2
jax: 0.10.0
libtpu: 0.0.40
codegen_flags: <defaults>
</compile_context>

<pallas_src>
import math
from functools import partial

import jax
import jax.numpy as jnp
from jax.experimental import pallas as pl
from jax.experimental.pallas import tpu as pltpu


def _round_up(x: int, m: int) -> int:
    return ((x + m - 1) // m) * m


def _fc_fused_kernel(x_ref, *refs):
    """Fused multi-layer FC.

    refs = (w0_ref, ..., w{L-1}_ref, o_ref)
      x_ref : (TILE_B, K0)      input tile, compute dtype (bf16 by default)
      wi_ref: (K_i, N_i)        pre-transposed, pre-scaled, zero-padded weight
      o_ref : (TILE_B, N_last)  float32 output tile
    Intermediates live in vregs; MXU accumulates in f32.
    """
    w_refs = refs[:-1]
    o_ref = refs[-1]

    h = x_ref[...]
    for w_ref in w_refs:
        # Cast right before the dot -> bf16 MXU inputs, f32 accumulation.
        y = jnp.dot(h.astype(w_ref.dtype), w_ref[...],
                    preferred_element_type=jnp.float32)
        h = jnp.maximum(y, jnp.float32(0.0))  # fused ReLU (f32)
    o_ref[...] = h.astype(o_ref.dtype)


def prepare_fc_params(weights, lane_pad: int = 128, compute_dtype=jnp.bfloat16):
    """One-time parameter preparation.

    weights: list of (num_units, prev_units) arrays (PyTorch layout).
    Returns (prepared_weights, out_dim): each prepared weight is (K_pad, N_pad)
    in `compute_dtype`, pre-transposed, pre-scaled by 1/sqrt(K) for layers i>0
    (scale folded in f32 BEFORE the narrow cast), zero-padded so the activation
    lane axis is a multiple of `lane_pad`.
    """
    prepared = []
    for i, w in enumerate(weights):
        w = jnp.asarray(w, jnp.float32)
        n, k = w.shape
        scale = 1.0 if i == 0 else 1.0 / math.sqrt(k)  # num_units_in == k
        w_kn = w.T * jnp.float32(scale)                # (k, n), scaled in f32
        n_pad = _round_up(n, lane_pad)
        k_pad = k if i == 0 else _round_up(k, lane_pad)  # matches prev n_pad
        w_p = jnp.zeros((k_pad, n_pad), jnp.float32).at[:k, :n].set(w_kn)
        prepared.append(w_p.astype(compute_dtype))
    out_dim = int(weights[-1].shape[0]) if weights else None
    return prepared, out_dim


def fc_forward(x: jnp.ndarray, prepared_weights, out_dim, *,
               tile_b: int = 512, unpad: bool = True):
    """Fused FC forward using prepared (transposed/scaled/padded) weights.

    x: (radii_batch, dim_in) float32.
    """
    if not prepared_weights:
        return x  # num_layers == 0 -> identity

    B, K0 = x.shape
    assert prepared_weights[0].shape[0] == K0, "dim_in mismatch"
    n_pad_last = prepared_weights[-1].shape[1]
    cdt = prepared_weights[0].dtype
    pack = 16 if cdt == jnp.bfloat16 else 8  # sublane packing of compute dtype

    tile_b = max(pack, (tile_b // pack) * pack)

    # --- batch tile selection -------------------------------------------------
    if B <= pack:
        tile = _round_up(B, pack)                      # single tiny tile
    elif B <= 2 * tile_b:
        # Use >= 2 row-tiles so the "parallel" axis can shard across v7x's two
        # TensorCores; harmless on single-TC v5e/v6e.
        tile = min(tile_b, _round_up(-(-B // 2), pack))
    else:
        tile = tile_b

    b_pad = _round_up(B, tile)
    x = x.astype(cdt)                                   # halve x DMA bytes (bf16)
    if b_pad != B:
        # Zero rows are exact (padded weight rows are zero / sliced off).
        x = jnp.pad(x, ((0, b_pad - B), (0, 0)))

    grid = (b_pad // tile,)

    # --- VMEM budget / fit check ---------------------------------------------
    x_bytes = 2 * tile * K0 * x.dtype.itemsize                      # double-buffered
    o_bytes = 2 * tile * n_pad_last * 4                             # f32 out, 2 bufs
    w_bytes = 2 * sum(int(w.size) * w.dtype.itemsize for w in prepared_weights)
    footprint = x_bytes + o_bytes + w_bytes
    if footprint > (56 << 20):
        # TODO(synk): N/K-tiled fallback for very wide layers (v7x 64 MiB/TC).
        raise ValueError(
            f"FC resident footprint {footprint >> 20} MiB exceeds single-TC VMEM budget")
    vmem_limit = min(max(int(1.5 * footprint) + (4 << 20), 16 << 20), 64 << 20)

    # --- specs ----------------------------------------------------------------
    in_specs = [pl.BlockSpec((tile, K0), lambda i: (i, 0))]
    # Weights: full-array blocks, constant block index -> stay resident.
    in_specs += [pl.BlockSpec(w.shape, lambda i: (0, 0)) for w in prepared_weights]
    out_specs = pl.BlockSpec((tile, n_pad_last), lambda i: (i, 0))

    out = pl.pallas_call(
        _fc_fused_kernel,
        out_shape=jax.ShapeDtypeStruct((b_pad, n_pad_last), jnp.float32),
        grid=grid,
        in_specs=in_specs,
        out_specs=out_specs,
        compiler_params=pltpu.CompilerParams(
            dimension_semantics=("parallel",),
            vmem_limit_bytes=int(vmem_limit)),
    )(x, *prepared_weights)

    if not unpad:
        return out  # padded (b_pad, n_pad_last) slab; consumer indexes it
    if b_pad != B or n_pad_last != out_dim:
        out = out[:B, :out_dim]
    return out


def fc_forward_reference(x: jnp.ndarray, weights) -> jnp.ndarray:
    """Plain-JAX f32 reference matching the PyTorch module exactly."""
    for i, w in enumerate(weights):
        num_units_in = x.shape[1]
        w = jnp.asarray(w, jnp.float32)
        if i == 0:
            x = jax.nn.relu(x @ w.T)
        else:
            x = jax.nn.relu(x @ (w.T / num_units_in ** 0.5))
    return x


def fc_forward_reference_bf16(x: jnp.ndarray, weights) -> jnp.ndarray:
    """Reference emulating the kernel's bf16-input / f32-accumulate numerics."""
    h = x.astype(jnp.bfloat16)
    for i, w in enumerate(weights):
        k = w.shape[1]
        scale = 1.0 if i == 0 else 1.0 / math.sqrt(k)
        w_kn = (jnp.asarray(w, jnp.float32).T * jnp.float32(scale)).astype(jnp.bfloat16)
        y = jnp.dot(h.astype(jnp.bfloat16), w_kn, preferred_element_type=jnp.float32)
        h = jnp.maximum(y, jnp.float32(0.0))
    return h


if __name__ == "__main__":
    # Small shapes consistent with the module's forward: x is (radii_batch, dim_in).
    dim_in = 32
    num_units = 32
    num_layers = 2
    batch = 8

    key = jax.random.PRNGKey(0)
    kx, kx2, *kws = jax.random.split(key, 2 + num_layers)

    x = jax.random.normal(kx, (batch, dim_in), dtype=jnp.float32)
    x_big = jax.random.normal(kx2, (100, dim_in), dtype=jnp.float32)  # multi-tile path

    # Deterministic params mirroring torch.randn(num_units, prev_num_units).
    weights = []
    prev = dim_in
    for i in range(num_layers):
        weights.append(jax.random.normal(kws[i], (num_units, prev), dtype=jnp.float32))
        prev = num_units

    # --- f32 compute path: tight structural check vs the exact f32 reference.
    prepared_f32, out_dim = prepare_fc_params(weights, compute_dtype=jnp.float32)
    out_f32 = jax.block_until_ready(fc_forward(x, prepared_f32, out_dim))
    ref_f32 = fc_forward_reference(x, weights)
    assert out_f32.shape == (batch, num_units), out_f32.shape
    assert jnp.allclose(out_f32, ref_f32, atol=1e-4, rtol=1e-4), "f32 path mismatch"

    # --- bf16 compute path (default): check vs bf16-emulated reference.
    #     (1/sqrt(K) folding reassociates the scaling vs the reference; the
    #      remaining diffs are bf16-rounding level.)
    prepared_bf16, out_dim = prepare_fc_params(weights)  # bf16 default
    fwd = jax.jit(lambda xx, ws: fc_forward(xx, ws, out_dim))

    out_bf16 = jax.block_until_ready(fwd(x, prepared_bf16))
    ref_bf16 = fc_forward_reference_bf16(x, weights)
    assert out_bf16.shape == (batch, num_units), out_bf16.shape
    assert jnp.allclose(out_bf16, ref_bf16, atol=1e-2, rtol=1e-2), "bf16 path mismatch"

    # Larger batch: exercises >=2 row-tiles (v7x megacore split), batch padding,
    # and the padded-output slice.
    out_big = jax.block_until_ready(fwd(x_big, prepared_bf16))
    ref_big = fc_forward_reference_bf16(x_big, weights)
    assert out_big.shape == (100, num_units), out_big.shape
    assert jnp.allclose(out_big, ref_big, atol=1e-2, rtol=1e-2), "bf16 big-batch mismatch"

    # num_layers == 0 identity path.
    id_out = fc_forward(x, [], None)
    assert jnp.array_equal(id_out, x)

    print("KERNEL_OK")
</pallas_src>

<mosaic_0001>
module attributes {stable_mosaic.version = 11 : i64} {
  func.func @_fc_fused_kernel(%arg0: i32, %arg1: memref<8x32xf32, #tpu.memory_space<vmem>>, %arg2: memref<32x128xf32, #tpu.memory_space<vmem>>, %arg3: memref<128x128xf32, #tpu.memory_space<vmem>>, %arg4: memref<8x128xf32, #tpu.memory_space<vmem>>) attributes {dimension_semantics = [#tpu.dimension_semantics<parallel>], iteration_bounds = array<i64: 1>, scalar_prefetch = 0 : i64, scratch_operands = 0 : i64, tpu.core_type = #tpu.core_type<tc>, window_params = [{transform_indices = @transform_0, window_bounds = array<i64: 8, 32>}, {pipeline_mode = #tpu.pipeline_mode<synchronous>, transform_indices = @transform_1, window_bounds = array<i64: 32, 128>}, {pipeline_mode = #tpu.pipeline_mode<synchronous>, transform_indices = @transform_2, window_bounds = array<i64: 128, 128>}, {transform_indices = @transform_3, window_bounds = array<i64: 8, 128>}]} {
    %c0 = arith.constant 0 : index
    %c0_0 = arith.constant 0 : index
    %0 = vector.load %arg1[%c0, %c0_0] : memref<8x32xf32, #tpu.memory_space<vmem>>, vector<8x32xf32>
    %c0_1 = arith.constant 0 : index
    %c0_2 = arith.constant 0 : index
    %1 = vector.load %arg2[%c0_1, %c0_2] : memref<32x128xf32, #tpu.memory_space<vmem>>, vector<32x128xf32>
    %cst = arith.constant dense<0.000000e+00> : vector<8x128xf32>
    %2 = tpu.matmul %0, %1, %cst {dimension_numbers = #tpu.dot_dimension_numbers<[1], [0], [0], [1], [0, 0, 1, 1], [], []>} : vector<8x32xf32>, vector<32x128xf32>, vector<8x128xf32> -> vector<8x128xf32>
    %cst_3 = arith.constant 0.000000e+00 : f32
    %3 = vector.broadcast %cst_3 : f32 to vector<8x128xf32>
    %4 = arith.maximumf %2, %3 : vector<8x128xf32>
    %c0_4 = arith.constant 0 : index
    %c0_5 = arith.constant 0 : index
    %5 = vector.load %arg3[%c0_4, %c0_5] : memref<128x128xf32, #tpu.memory_space<vmem>>, vector<128x128xf32>
    %cst_6 = arith.constant dense<0.000000e+00> : vector<8x128xf32>
    %6 = tpu.matmul %4, %5, %cst_6 {dimension_numbers = #tpu.dot_dimension_numbers<[1], [0], [0], [1], [0, 0, 1, 1], [], []>} : vector<8x128xf32>, vector<128x128xf32>, vector<8x128xf32> -> vector<8x128xf32>
    %cst_7 = arith.constant 0.000000e+00 : f32
    %7 = vector.broadcast %cst_7 : f32 to vector<8x128xf32>
    %8 = arith.maximumf %6, %7 : vector<8x128xf32>
    %c0_8 = arith.constant 0 : index
    %c0_9 = arith.constant 0 : index
    %9 = vector.load %arg4[%c0_8, %c0_9] : memref<8x128xf32, #tpu.memory_space<vmem>>, vector<8x128xf32>
    tpu.vector_store %arg4[%c0_8, %c0_9], %8 {strides = array<i32>} : memref<8x128xf32, #tpu.memory_space<vmem>>, vector<8x128xf32>,
    return
  }
  func.func @transform_0(%arg0: i32) -> (i32, i32) {
    %c0_i32 = arith.constant 0 : i32
    %c0_i32_0 = arith.constant 0 : i32
    return %arg0, %c0_i32 : i32, i32
  }
  func.func @transform_1(%arg0: i32) -> (i32, i32) {
    %c0_i32 = arith.constant 0 : i32
    %c0_i32_0 = arith.constant 0 : i32
    %c0_i32_1 = arith.constant 0 : i32
    return %c0_i32, %c0_i32_0 : i32, i32
  }
  func.func @transform_2(%arg0: i32) -> (i32, i32) {
    %c0_i32 = arith.constant 0 : i32
    %c0_i32_0 = arith.constant 0 : i32
    %c0_i32_1 = arith.constant 0 : i32
    return %c0_i32, %c0_i32_0 : i32, i32
  }
  func.func @transform_3(%arg0: i32) -> (i32, i32) {
    %c0_i32 = arith.constant 0 : i32
    %c0_i32_0 = arith.constant 0 : i32
    return %arg0, %c0_i32 : i32, i32
  }
}

</mosaic_0001>

<bundles_post_ra>
// kernel: tpu_custom_call.1
= control target key start
LH: loop header
LB: loop body
LE: loop exit
PB: predicated region body
PF: predicated region fallthrough
CT: control target
= control target key end

     0   :  { %8 = vsyncpa [#allocation3], 0  ;;  %s293_s0 = inlined_call_operand.hbm [shape: f32[8,32], index: 0, kind: input, shape index: {}]   ;;  %s294_s1 = inlined_call_operand.hbm [shape: f32[32,128], index: 1, kind: input, shape index: {}]   ;;  %s295_s2 = inlined_call_operand.hbm [shape: f32[128,128], index: 2, kind: input, shape index: {}]   ;;  %s296_s3 = inlined_call_operand.hbm [shape: f32[8,128], index: 3, kind: output, shape index: {}]  }
   0x1   :  { %9 = vsyncpa [#allocation6], 0  ;;  %s26_s14 = sshll.u32 %s294_s1, 4  ;;  %s27_s14 = int_to_ptr.hbm [resolvable:$true] %s26_s14 }
   0x2   :  { %10 = vsyncpa [#allocation4], 0  ;;  %s255_s15 = smov [#allocation5]   ;;  %s16_s19 = sshll.u32 %s293_s0, 4  ;;  %s17_s19 = int_to_ptr.hbm [resolvable:$true] %s16_s19 }
   0x3   :  { %s28_s16 = sshll.u32 %s255_s15, 4  ;;  %s256_s20 = smov 128   ;;  %s29_s16 = int_to_ptr.vmem [resolvable:$true] %s28_s16 }
   0x4   :  { %s257_s21 = smov 8   ;;  %s258_s22 = smov [#allocation2]  }
   0x5   :  { %34 = dma.hbm_to_vmem [thread:$0]  %s27_s14, 512, %s29_s16, [#allocation6], %s256_s20, %s256_s20, %s257_s21  }
   0x6   :  { %s18_s23 = sshll.u32 %s258_s22, 4  ;;  %s39_s26 = sshll.u32 %s295_s2, 4  ;;  %s19_s23 = int_to_ptr.vmem [resolvable:$true] %s18_s23  ;;  %s40_s26 = int_to_ptr.hbm [resolvable:$true] %s39_s26 }
   0x7   :  { %21 = dma.hbm_to_vmem [thread:$0]  %s17_s19, 128, %s19_s23, [#allocation3]  }
   0x8   :  { %s259_s1 = smov [#allocation7]  }
   0x9   :  { %s41_s27 = sshll.u32 %s259_s1, 4  ;;  %s42_s27 = int_to_ptr.vmem [resolvable:$true] %s41_s27 }
   0xa   :  { %47 = dma.hbm_to_vmem [thread:$0]  %s40_s26, 2048, %s42_s27, [#allocation6], %s256_s20, %s256_s20, %s257_s21  }
   0xb   :  { %249 = dma.done.wait [#allocation3], 128  }
   0xc   :  { %250 = vsyncadd [#allocation3], 4294967168 }
   0xd   :  { %251 = dma.done.wait [#allocation6], 2560  }
   0xe   :  { %252 = vsyncadd [#allocation6], 4294964736  ;;  %v64_v0 = vld [vmem:[#allocation5 + $0x18] sm:$0xff]  ;;  %v63_v1 = vld [vmem:[#allocation5 + $0x10] sm:$0xff]  ;;  %vm65_vm0 = vcmask 261120   ;;  %s260_s0 = smov [#allocation8]  }
   0xf   :  { %81 = vmatpush.msra.mxu0 %v64_v0  ;;  %v105_v2 = vld [vmem:[#allocation7 + $0x78] sm:$0xff]  ;;  %v62_v3 = vld [vmem:[#allocation5 + $0x8] sm:$0xff]  ;;  %v104_v4 = vld [vmem:[#allocation7 + $0x70] sm:$0xff]  ;;  %s133_s2 = sshll.u32 %s260_s0, 4  ;;  %s135_s30 = sshll.u32 %s296_s3, 4  ;;  %s134_s2 = int_to_ptr.vmem [resolvable:$true] %s133_s2  ;;  %s136_s30 = int_to_ptr.hbm [resolvable:$true] %s135_s30 }
  0x10   :  { %106 = vmatpush.msra.mxu1 %v105_v2  ;;  %v103_v5 = vld [vmem:[#allocation7 + $0x68] sm:$0xff]  ;;  %v61_v6 = vld [vmem:[#allocation5] sm:$0xff]  ;;  %v60_v7 = vld [vmem:[#allocation2] sm:$0xff] }
  0x11   :  { %82 = vmatpush.msra.mxu0 %v63_v1  ;;  %v102_v8 = vld [vmem:[#allocation7 + $0x60] sm:$0xff]  ;;  %v101_v9 = vld [vmem:[#allocation7 + $0x58] sm:$0xff]  ;;  %v100_v10 = vld [vmem:[#allocation7 + $0x50] sm:$0xff] }
  0x12   :  { %107 = vmatpush.msra.mxu1 %v104_v4  ;;  %v99_v11 = vld [vmem:[#allocation7 + $0x48] sm:$0xff]  ;;  %v98_v12 = vld [vmem:[#allocation7 + $0x40] sm:$0xff]  ;;  %v97_v13 = vld [vmem:[#allocation7 + $0x38] sm:$0xff] }
  0x13   :  { %83 = vmatpush.msra.mxu0 %v62_v3  ;;  %v96_v14 = vld [vmem:[#allocation7 + $0x30] sm:$0xff]  ;;  %v95_v15 = vld [vmem:[#allocation7 + $0x28] sm:$0xff]  ;;  %v94_v16 = vld [vmem:[#allocation7 + $0x20] sm:$0xff] }
  0x14   :  { %108 = vmatpush.msra.mxu1 %v103_v5  ;;  %v93_v17 = vld [vmem:[#allocation7 + $0x18] sm:$0xff]  ;;  %v92_v18 = vld [vmem:[#allocation7 + $0x10] sm:$0xff]  ;;  %v91_v19 = vld [vmem:[#allocation7 + $0x8] sm:$0xff] }
  0x15   :  { %84 = vmatpush.msra.mxu0 %v61_v6  ;;  %v90_v20 = vld [vmem:[#allocation7] sm:$0xff] }
  0x16   :  { %146 = vmatmul.msk.f32.vlgmr.msra.gmra.mxu0 %vm65_vm0, %v60_v7  ;;  %109 = vmatpush.msra.mxu1 %v102_v8 }
  0x18   :  { %110 = vmatpush.msra.mxu1 %v101_v9 }
  0x1a   :  { %111 = vmatpush.msra.mxu1 %v100_v10 }
  0x1c   :  { %112 = vmatpush.msra.mxu1 %v99_v11 }
  0x1e   :  { %113 = vmatpush.msra.mxu1 %v98_v12 }
  0x20   :  { %114 = vmatpush.msra.mxu1 %v97_v13 }
  0x22   :  { %115 = vmatpush.msra.mxu1 %v96_v14 }
  0x24   :  { %116 = vmatpush.msra.mxu1 %v95_v15 }
  0x26   :  { %117 = vmatpush.msra.mxu1 %v94_v16 }
  0x28   :  { %118 = vmatpush.msra.mxu1 %v93_v17 }
  0x2a   :  { %119 = vmatpush.msra.mxu1 %v92_v18 }
  0x2c   :  { %120 = vmatpush.msra.mxu1 %v91_v19 }
  0x2e   :  { %121 = vmatpush.msra.mxu1 %v90_v20 }
  0x93   :  { %v86_v21 = vpop.f32.mrf.mxu0 }
  0x94   :  { %v89_v22 = vmax.f32 %v86_v21, 0.0 }
  0x96   :  { %122 = vmatmul.f32.vlgmr.msra.gmra.mxu1 %v89_v22 }
 0x113   :  { %v123_v23 = vpop.f32.mrf.mxu1 }
 0x114   :  { %v126_v24 = vmax.f32 %v123_v23, 0.0 }
 0x116   :  { %127 = vst [vmem:[#allocation8] sm:$0xff] %v126_v24 }
 0x117   :  { %138 = dma.vmem_to_hbm [thread:$0]  %s134_s2, 128, %s136_s30, [#allocation4]  }
 0x118   :  { %253 = dma.done.wait [#allocation4], 128  }
 0x119   :  { %254 = vsyncadd [#allocation4], 4294967168 }
 0x11a   :  { %143 = vsyncpa [#allocation3], 1 }
 0x11b   :  { %144 = vsyncpa [#allocation6], 1 }
 0x11c   :  { %145 = vsyncpa [#allocation4], 1 }

</bundles_post_ra>
